<compile_context>
chip_gen: v6e
topology: v6e:2x2x1
jax: 0.10.0
libtpu: 0.0.40
codegen_flags: <defaults>
</compile_context>

<pallas_src>
import jax
import jax.numpy as jnp
from jax.experimental import pallas as pl
from jax.experimental.pallas import tpu as pltpu

BN_EPS = 1e-5
LANE = 128


def _round_up(n, m):
    return ((n + m - 1) // m) * m


def _pick_tile_n(d_pad):
    """Lane-dense N tile for the final Linear; only tile if >= 2 grid steps."""
    for cand in (512, 256, 128):
        if d_pad % cand == 0 and d_pad // cand >= 2:
            return cand
    return d_pad


def _make_generator_kernel(n_res, true_batch, batch_pad, e_pad, col_starts,
                           o_pads, mm_dtype):
    """Build the kernel, closed over the static network structure.

    Ref layout: (x, [W_k, gb_k] * n_res, W_final_tile, b_final_tile,
                 out_tile, H_scratch)
      W_k        : (col_starts[k], o_pads[k])   mm_dtype, slab-column-ordered
      gb_k       : (2, o_pads[k])               f32, rows = (gamma, beta)
      W_final    : (total_cols, tile_n)         mm_dtype, N-tiled over the grid
      b_final    : (1, tile_n)                  f32, N-tiled
      H_scratch  : (batch_pad, total_cols)      mm_dtype, persistent slab
    """
    inv_n = 1.0 / float(true_batch)

    def kernel(*refs):
        x_ref = refs[0]
        wf_ref = refs[1 + 2 * n_res]
        bf_ref = refs[2 + 2 * n_res]
        out_ref = refs[3 + 2 * n_res]
        h_ref = refs[4 + 2 * n_res]
        p = refs[1:1 + 2 * n_res]

        # The (small) residual stack runs once, on the first N-tile, into the
        # persistent VMEM slab; later grid steps only re-run the final dot.
        @pl.when(pl.program_id(0) == 0)
        def _build_stack():
            if batch_pad != true_batch:
                row = jax.lax.broadcasted_iota(jnp.int32, (batch_pad, 1), 0)
                row_mask = (row < true_batch).astype(jnp.float32)
            else:
                row_mask = None

            # x was cast to mm_dtype once in the wrapper: plain store.
            h_ref[:, 0:e_pad] = x_ref[...]

            for k in range(n_res):
                cols = col_starts[k]          # static, 128-aligned K extent
                o_pad = o_pads[k]
                w = p[2 * k][...]             # (cols, o_pad) mm_dtype
                gb = p[2 * k + 1][...]        # (2, o_pad) f32
                gamma = gb[0:1, :]
                beta = gb[1:2, :]

                # One MXU dot per layer over the shared lane-aligned slab.
                # (Residual Linear bias omitted: cancelled by BN mean sub.)
                z = jnp.dot(h_ref[:, 0:cols], w,
                            preferred_element_type=jnp.float32)

                # BatchNorm1d (train mode, biased variance) folded into one
                # scale/shift per feature.  Padded rows of H are zero, so the
                # unmasked sums are exact; divide by the true batch size.
                mean = jnp.sum(z, axis=0, keepdims=True) * inv_n
                mean_sq = jnp.sum(z * z, axis=0, keepdims=True) * inv_n
                var = jnp.maximum(mean_sq - mean * mean, 0.0)
                scale = gamma * jax.lax.rsqrt(var + BN_EPS)    # EUP slot
                shift = beta - mean * scale
                y = jnp.maximum(z * scale + shift, 0.0)        # 2 VALU ops/elem
                if row_mask is not None:
                    # Keep the zero-padded-row invariant of H for later layers.
                    y = y * row_mask
                # Single cast to mm_dtype; 128-aligned column store into H.
                h_ref[:, cols:cols + o_pad] = y.astype(mm_dtype)

        # Final Linear for this N-tile: one dot over the whole slab (+ bias).
        acc = jnp.dot(h_ref[...], wf_ref[...],
                      preferred_element_type=jnp.float32)
        out_ref[...] = (acc + bf_ref[...]).astype(out_ref.dtype)

    return kernel


def init_generator_params(key, embedding_dim, generator_dim, data_dim):
    """Deterministic synthetic parameter init (shapes match the torch module)."""
    params = {"residuals": [], "final": None}
    dim = embedding_dim
    for item in generator_dim:
        key, kw, kb = jax.random.split(key, 3)
        w = jax.random.normal(kw, (dim, item), jnp.float32) * 0.05  # [in, out]
        b = jax.random.normal(kb, (item,), jnp.float32) * 0.05
        gamma = jnp.ones((item,), jnp.float32)   # BatchNorm1d default weight
        beta = jnp.zeros((item,), jnp.float32)   # BatchNorm1d default bias
        params["residuals"].append((w, b, gamma, beta))
        dim += item
    key, kw, kb = jax.random.split(key, 3)
    w_f = jax.random.normal(kw, (dim, data_dim), jnp.float32) * 0.05
    b_f = jax.random.normal(kb, (data_dim,), jnp.float32) * 0.05
    params["final"] = (w_f, b_f)
    return params


def generator_forward(x, params, *, mm_dtype=jnp.bfloat16):
    """Wrapper: pad/stack parameters (XLA glue) and invoke the Pallas kernel.

    mm_dtype controls the MXU operand dtype (bf16 default: halves weight HBM
    traffic and avoids multi-pass f32 MXU work on all generations); BN/ReLU
    elementwise math and accumulation stay f32.  Use mm_dtype=jnp.float32 for
    bit-level agreement with the reference.
    """
    batch, embedding_dim = x.shape
    w_f, b_f = params["final"]
    data_dim = w_f.shape[1]
    n_res = len(params["residuals"])

    mm_dtype = jnp.dtype(mm_dtype)
    out_dtype = x.dtype
    # bf16 packs 16 rows per vreg: pad the batch to 16 so LHS M-tiles are full.
    sublane = 16 if mm_dtype == jnp.dtype(jnp.bfloat16) else 8
    b_pad = _round_up(batch, sublane)
    e_pad = _round_up(embedding_dim, LANE)
    d_pad = _round_up(data_dim, LANE)

    # Lane-dense input slab, cast to mm_dtype exactly once (wrapper side).
    x_p = jnp.zeros((b_pad, e_pad), mm_dtype).at[:batch, :embedding_dim].set(
        x.astype(mm_dtype))

    # Slab column layout: [x | y_0 | y_1 | ...], every chunk 128-padded.
    slab_chunks = [(0, embedding_dim)]   # (slab column offset, true dim)
    col_starts, o_pads = [], []
    flat = []
    flops = 0
    rsqrts = 0
    next_col = e_pad
    for (w, b, gamma, beta) in params["residuals"]:
        del b  # residual Linear bias cancelled by train-mode BN mean subtraction
        o = w.shape[1]
        o_pad = _round_up(o, LANE)
        cols = next_col
        # Re-stack the torch weight row blocks (order [y_{k-1},...,y_0,x]) into
        # slab column order so the kernel does ONE dot over H[:, :cols].
        w_stk = jnp.zeros((cols, o_pad), jnp.float32)
        row0 = 0
        for (off, cdim) in reversed(slab_chunks):
            w_stk = w_stk.at[off:off + cdim, :o].set(w[row0:row0 + cdim, :])
            row0 += cdim
        assert row0 == w.shape[0]
        gb = jnp.zeros((2, o_pad), jnp.float32)
        gb = gb.at[0, :o].set(gamma).at[1, :o].set(beta)
        flat.append(w_stk.astype(mm_dtype))
        flat.append(gb)
        col_starts.append(cols)
        o_pads.append(o_pad)
        flops += 2 * b_pad * cols * o_pad
        rsqrts += o_pad
        slab_chunks.append((next_col, o))
        next_col += o_pad
    total_cols = next_col

    # Final Linear: rows stacked to slab order, lane-padded columns, + bias.
    wf_stk = jnp.zeros((total_cols, d_pad), jnp.float32)
    row0 = 0
    for (off, cdim) in reversed(slab_chunks):
        wf_stk = wf_stk.at[off:off + cdim, :data_dim].set(w_f[row0:row0 + cdim, :])
        row0 += cdim
    assert row0 == w_f.shape[0]
    wf_stk = wf_stk.astype(mm_dtype)
    bf_p = jnp.zeros((1, d_pad), jnp.float32).at[0, :data_dim].set(b_f)
    flops += 2 * b_pad * total_cols * d_pad

    # N-tile the final Linear so its (dominant) weight stream is
    # double-buffered behind the matmul; residual stack runs on tile 0.
    tile_n = _pick_tile_n(d_pad)
    grid = (d_pad // tile_n,)

    kernel = _make_generator_kernel(n_res, batch, b_pad, e_pad,
                                    tuple(col_starts), tuple(o_pads), mm_dtype)

    in_specs = [pl.BlockSpec((b_pad, e_pad), lambda n: (0, 0))]
    for k in range(n_res):
        in_specs.append(pl.BlockSpec((col_starts[k], o_pads[k]),
                                     lambda n: (0, 0)))
        in_specs.append(pl.BlockSpec((2, o_pads[k]), lambda n: (0, 0)))
    in_specs.append(pl.BlockSpec((total_cols, tile_n), lambda n: (0, n)))
    in_specs.append(pl.BlockSpec((1, tile_n), lambda n: (0, n)))
    out_spec = pl.BlockSpec((b_pad, tile_n), lambda n: (0, n))

    # Generation-aware VMEM budget: resident operands + H slab (double-buffer
    # margin) + per-tile double-buffered final weight/bias/out + f32 temps.
    mm_isz = mm_dtype.itemsize
    resident = (x_p.size * mm_isz
                + sum(a.size * a.dtype.itemsize for a in flat)
                + b_pad * total_cols * mm_isz)
    tile_bytes = (total_cols * tile_n * mm_isz
                  + tile_n * 4
                  + b_pad * tile_n * jnp.dtype(out_dtype).itemsize)
    f32_tmp = 4 * b_pad * (2 * max(o_pads + [e_pad]) + tile_n)
    vmem_need = 2 * resident + 2 * tile_bytes + 2 * f32_tmp + (4 << 20)
    try:
        vmem_cap = int(pltpu.get_tpu_info().vmem_capacity_bytes)
    except Exception:
        vmem_cap = 64 << 20   # v7x-safe fallback
    vmem_limit = int(min(max(vmem_need, 16 << 20), 0.65 * vmem_cap))

    in_bytes = (x_p.size * mm_isz
                + sum(a.size * a.dtype.itemsize for a in flat)
                + wf_stk.size * mm_isz + bf_p.size * 4)
    out_bytes = b_pad * d_pad * jnp.dtype(out_dtype).itemsize
    h_bytes = b_pad * total_cols * mm_isz
    bytes_accessed = in_bytes + out_bytes + h_bytes * (n_res + 1 + grid[0])

    # TODO(synk): for v7x two-TC throughput, fuse >=2 independent generator
    # batches behind a leading 'parallel' grid axis; a single BN-coupled batch
    # must stay inside one program because the statistics span the full batch.
    out_p = pl.pallas_call(
        kernel,
        out_shape=jax.ShapeDtypeStruct((b_pad, d_pad), out_dtype),
        grid_spec=pltpu.PrefetchScalarGridSpec(
            num_scalar_prefetch=0,
            grid=grid,
            in_specs=in_specs,
            out_specs=out_spec,
            scratch_shapes=[pltpu.VMEM((b_pad, total_cols), mm_dtype)],
        ),
        compiler_params=pltpu.CompilerParams(
            # scratch slab H is carried across N-tiles -> serial axis
            dimension_semantics=("arbitrary",),
            vmem_limit_bytes=vmem_limit),
        cost_estimate=pl.CostEstimate(
            flops=int(flops),
            transcendentals=int(rsqrts),
            bytes_accessed=int(bytes_accessed)),
    )(x_p, *flat, wf_stk, bf_p)

    # Slice the lane-dense padded output slab back to the true shape.
    return out_p[:batch, :data_dim]


def generator_reference(x, params):
    """Pure-JAX reference mirroring the PyTorch module (train-mode BN)."""
    h = x.astype(jnp.float32)
    for (w, b, gamma, beta) in params["residuals"]:
        y = h @ w + b
        mean = jnp.mean(y, axis=0, keepdims=True)
        var = jnp.mean((y - mean) ** 2, axis=0, keepdims=True)
        y = gamma * (y - mean) / jnp.sqrt(var + BN_EPS) + beta
        y = jnp.maximum(y, 0.0)
        h = jnp.concatenate([y, h], axis=1)
    w_f, b_f = params["final"]
    return h @ w_f + b_f


if __name__ == "__main__":
    # Small shapes consistent with the module: batch=8, embedding_dim=32,
    # generator_dim=(32, 32), data_dim=16.
    batch = 8
    embedding_dim = 32
    generator_dim = (32, 32)
    data_dim = 16

    key = jax.random.PRNGKey(0)
    key, kx = jax.random.split(key)
    x = jax.random.normal(kx, (batch, embedding_dim), jnp.float32)

    params = init_generator_params(key, embedding_dim, generator_dim, data_dim)
    ref = generator_reference(x, params)

    # f32-MXU path: tight agreement with the reference (correctness gate).
    out_f32 = jax.block_until_ready(
        generator_forward(x, params, mm_dtype=jnp.float32))
    assert out_f32.shape == (batch, data_dim), out_f32.shape
    assert jnp.allclose(out_f32, ref, atol=1e-4, rtol=1e-4), "f32 mismatch"

    # Default bf16-MXU path (HBM/MXU optimal on v5e/v6e/v7x): sanity tolerance.
    out_bf16 = jax.block_until_ready(generator_forward(x, params))
    assert out_bf16.shape == (batch, data_dim), out_bf16.shape
    assert jnp.allclose(out_bf16, ref, atol=1e-1, rtol=1e-1), "bf16 mismatch"

    # TODO(synk): BatchNorm1d running_mean/running_var buffer updates (a
    # training-mode side effect) are not emitted; the forward output does not
    # depend on them.

    print("KERNEL_OK")
</pallas_src>

<mosaic_0001>
module attributes {stable_mosaic.version = 11 : i64} {
  func.func @kernel(%arg0: i32, %arg1: memref<8x128xf32, #tpu.memory_space<vmem>>, %arg2: memref<128x128xf32, #tpu.memory_space<vmem>>, %arg3: memref<2x128xf32, #tpu.memory_space<vmem>>, %arg4: memref<256x128xf32, #tpu.memory_space<vmem>>, %arg5: memref<2x128xf32, #tpu.memory_space<vmem>>, %arg6: memref<384x128xf32, #tpu.memory_space<vmem>>, %arg7: memref<1x128xf32, #tpu.memory_space<vmem>>, %arg8: memref<8x128xf32, #tpu.memory_space<vmem>>, %arg9: memref<8x384xf32, #tpu.memory_space<vmem>>) attributes {dimension_semantics = [#tpu.dimension_semantics<arbitrary>], iteration_bounds = array<i64: 1>, scalar_prefetch = 0 : i64, scratch_operands = 1 : i64, tpu.core_type = #tpu.core_type<tc>, window_params = [{pipeline_mode = #tpu.pipeline_mode<synchronous>, transform_indices = @transform_0, window_bounds = array<i64: 8, 128>}, {pipeline_mode = #tpu.pipeline_mode<synchronous>, transform_indices = @transform_1, window_bounds = array<i64: 128, 128>}, {pipeline_mode = #tpu.pipeline_mode<synchronous>, transform_indices = @transform_2, window_bounds = array<i64: 2, 128>}, {pipeline_mode = #tpu.pipeline_mode<synchronous>, transform_indices = @transform_3, window_bounds = array<i64: 256, 128>}, {pipeline_mode = #tpu.pipeline_mode<synchronous>, transform_indices = @transform_4, window_bounds = array<i64: 2, 128>}, {transform_indices = @transform_5, window_bounds = array<i64: 384, 128>}, {transform_indices = @transform_6, window_bounds = array<i64: 1, 128>}, {transform_indices = @transform_7, window_bounds = array<i64: 8, 128>}]} {
    %c0_i32 = arith.constant 0 : i32
    %0 = arith.cmpi eq, %arg0, %c0_i32 : i32
    %1 = arith.extui %0 : i1 to i32
    %c0_i32_0 = arith.constant 0 : i32
    %2 = arith.cmpi ne, %1, %c0_i32_0 : i32
    scf.if %2 {
      %c0_8 = arith.constant 0 : index
      %c0_9 = arith.constant 0 : index
      %10 = vector.load %arg1[%c0_8, %c0_9] : memref<8x128xf32, #tpu.memory_space<vmem>>, vector<8x128xf32>
      %c0_10 = arith.constant 0 : index
      %c0_11 = arith.constant 0 : index
      %11 = vector.load %arg9[%c0_10, %c0_11] : memref<8x384xf32, #tpu.memory_space<vmem>>, vector<8x128xf32>
      tpu.vector_store %arg9[%c0_10, %c0_11], %10 {strides = array<i32>} : memref<8x384xf32, #tpu.memory_space<vmem>>, vector<8x128xf32>,
      %c0_12 = arith.constant 0 : index
      %c0_13 = arith.constant 0 : index
      %12 = vector.load %arg2[%c0_12, %c0_13] : memref<128x128xf32, #tpu.memory_space<vmem>>, vector<128x128xf32>
      %c0_14 = arith.constant 0 : index
      %c0_15 = arith.constant 0 : index
      %13 = vector.load %arg3[%c0_14, %c0_15] : memref<2x128xf32, #tpu.memory_space<vmem>>, vector<2x128xf32>
      %14 = vector.extract_strided_slice %13 {offsets = [0, 0], sizes = [1, 128], strides = [1, 1]} : vector<2x128xf32> to vector<1x128xf32>
      %15 = vector.extract_strided_slice %13 {offsets = [1, 0], sizes = [1, 128], strides = [1, 1]} : vector<2x128xf32> to vector<1x128xf32>
      %c0_16 = arith.constant 0 : index
      %c0_17 = arith.constant 0 : index
      %16 = vector.load %arg9[%c0_16, %c0_17] : memref<8x384xf32, #tpu.memory_space<vmem>>, vector<8x128xf32>
      %cst_18 = arith.constant dense<0.000000e+00> : vector<8x128xf32>
      %17 = tpu.matmul %16, %12, %cst_18 {dimension_numbers = #tpu.dot_dimension_numbers<[1], [0], [0], [1], [0, 0, 1, 1], [], []>} : vector<8x128xf32>, vector<128x128xf32>, vector<8x128xf32> -> vector<8x128xf32>
      %cst_19 = arith.constant dense<0.000000e+00> : vector<128xf32>
      %18 = vector.multi_reduction <add>, %17, %cst_19 [0] : vector<8x128xf32> to vector<128xf32>
      %19 = vector.shape_cast %18 : vector<128xf32> to vector<1x128xf32>
      %cst_20 = arith.constant 1.250000e-01 : f32
      %20 = vector.broadcast %cst_20 : f32 to vector<1x128xf32>
      %21 = arith.mulf %19, %20 : vector<1x128xf32>
      %22 = arith.mulf %17, %17 : vector<8x128xf32>
      %cst_21 = arith.constant dense<0.000000e+00> : vector<128xf32>
      %23 = vector.multi_reduction <add>, %22, %cst_21 [0] : vector<8x128xf32> to vector<128xf32>
      %24 = vector.shape_cast %23 : vector<128xf32> to vector<1x128xf32>
      %cst_22 = arith.constant 1.250000e-01 : f32
      %25 = vector.broadcast %cst_22 : f32 to vector<1x128xf32>
      %26 = arith.mulf %24, %25 : vector<1x128xf32>
      %27 = arith.mulf %21, %21 : vector<1x128xf32>
      %28 = arith.subf %26, %27 : vector<1x128xf32>
      %cst_23 = arith.constant 0.000000e+00 : f32
      %29 = vector.broadcast %cst_23 : f32 to vector<1x128xf32>
      %30 = arith.maximumf %28, %29 : vector<1x128xf32>
      %cst_24 = arith.constant 9.99999974E-6 : f32
      %31 = vector.broadcast %cst_24 : f32 to vector<1x128xf32>
      %32 = arith.addf %30, %31 : vector<1x128xf32>
      %33 = math.rsqrt %32 : vector<1x128xf32>
      %34 = arith.mulf %14, %33 : vector<1x128xf32>
      %35 = arith.mulf %21, %34 : vector<1x128xf32>
      %36 = arith.subf %15, %35 : vector<1x128xf32>
      %37 = vector.broadcast %34 : vector<1x128xf32> to vector<8x128xf32>
      %38 = arith.mulf %17, %37 : vector<8x128xf32>
      %39 = vector.broadcast %36 : vector<1x128xf32> to vector<8x128xf32>
      %40 = arith.addf %38, %39 : vector<8x128xf32>
      %cst_25 = arith.constant 0.000000e+00 : f32
      %41 = vector.broadcast %cst_25 : f32 to vector<8x128xf32>
      %42 = arith.maximumf %40, %41 : vector<8x128xf32>
      %c0_26 = arith.constant 0 : index
      %c128 = arith.constant 128 : index
      %43 = vector.load %arg9[%c0_26, %c128] : memref<8x384xf32, #tpu.memory_space<vmem>>, vector<8x128xf32>
      tpu.vector_store %arg9[%c0_26, %c128], %42 {strides = array<i32>} : memref<8x384xf32, #tpu.memory_space<vmem>>, vector<8x128xf32>,
      %c0_27 = arith.constant 0 : index
      %c0_28 = arith.constant 0 : index
      %44 = vector.load %arg4[%c0_27, %c0_28] : memref<256x128xf32, #tpu.memory_space<vmem>>, vector<256x128xf32>
      %c0_29 = arith.constant 0 : index
      %c0_30 = arith.constant 0 : index
      %45 = vector.load %arg5[%c0_29, %c0_30] : memref<2x128xf32, #tpu.memory_space<vmem>>, vector<2x128xf32>
      %46 = vector.extract_strided_slice %45 {offsets = [0, 0], sizes = [1, 128], strides = [1, 1]} : vector<2x128xf32> to vector<1x128xf32>
      %47 = vector.extract_strided_slice %45 {offsets = [1, 0], sizes = [1, 128], strides = [1, 1]} : vector<2x128xf32> to vector<1x128xf32>
      %c0_31 = arith.constant 0 : index
      %c0_32 = arith.constant 0 : index
      %48 = vector.load %arg9[%c0_31, %c0_32] : memref<8x384xf32, #tpu.memory_space<vmem>>, vector<8x256xf32>
      %cst_33 = arith.constant dense<0.000000e+00> : vector<8x128xf32>
      %49 = tpu.matmul %48, %44, %cst_33 {dimension_numbers = #tpu.dot_dimension_numbers<[1], [0], [0], [1], [0, 0, 1, 1], [], []>} : vector<8x256xf32>, vector<256x128xf32>, vector<8x128xf32> -> vector<8x128xf32>
      %cst_34 = arith.constant dense<0.000000e+00> : vector<128xf32>
      %50 = vector.multi_reduction <add>, %49, %cst_34 [0] : vector<8x128xf32> to vector<128xf32>
      %51 = vector.shape_cast %50 : vector<128xf32> to vector<1x128xf32>
      %cst_35 = arith.constant 1.250000e-01 : f32
      %52 = vector.broadcast %cst_35 : f32 to vector<1x128xf32>
      %53 = arith.mulf %51, %52 : vector<1x128xf32>
      %54 = arith.mulf %49, %49 : vector<8x128xf32>
      %cst_36 = arith.constant dense<0.000000e+00> : vector<128xf32>
      %55 = vector.multi_reduction <add>, %54, %cst_36 [0] : vector<8x128xf32> to vector<128xf32>
      %56 = vector.shape_cast %55 : vector<128xf32> to vector<1x128xf32>
      %cst_37 = arith.constant 1.250000e-01 : f32
      %57 = vector.broadcast %cst_37 : f32 to vector<1x128xf32>
      %58 = arith.mulf %56, %57 : vector<1x128xf32>
      %59 = arith.mulf %53, %53 : vector<1x128xf32>
      %60 = arith.subf %58, %59 : vector<1x128xf32>
      %cst_38 = arith.constant 0.000000e+00 : f32
      %61 = vector.broadcast %cst_38 : f32 to vector<1x128xf32>
      %62 = arith.maximumf %60, %61 : vector<1x128xf32>
      %cst_39 = arith.constant 9.99999974E-6 : f32
      %63 = vector.broadcast %cst_39 : f32 to vector<1x128xf32>
      %64 = arith.addf %62, %63 : vector<1x128xf32>
      %65 = math.rsqrt %64 : vector<1x128xf32>
      %66 = arith.mulf %46, %65 : vector<1x128xf32>
      %67 = arith.mulf %53, %66 : vector<1x128xf32>
      %68 = arith.subf %47, %67 : vector<1x128xf32>
      %69 = vector.broadcast %66 : vector<1x128xf32> to vector<8x128xf32>
      %70 = arith.mulf %49, %69 : vector<8x128xf32>
      %71 = vector.broadcast %68 : vector<1x128xf32> to vector<8x128xf32>
      %72 = arith.addf %70, %71 : vector<8x128xf32>
      %cst_40 = arith.constant 0.000000e+00 : f32
      %73 = vector.broadcast %cst_40 : f32 to vector<8x128xf32>
      %74 = arith.maximumf %72, %73 : vector<8x128xf32>
      %c0_41 = arith.constant 0 : index
      %c256 = arith.constant 256 : index
      %75 = vector.load %arg9[%c0_41, %c256] : memref<8x384xf32, #tpu.memory_space<vmem>>, vector<8x128xf32>
      tpu.vector_store %arg9[%c0_41, %c256], %74 {strides = array<i32>} : memref<8x384xf32, #tpu.memory_space<vmem>>, vector<8x128xf32>,
    } else {
    }
    %c0 = arith.constant 0 : index
    %c0_1 = arith.constant 0 : index
    %3 = vector.load %arg9[%c0, %c0_1] : memref<8x384xf32, #tpu.memory_space<vmem>>, vector<8x384xf32>
    %c0_2 = arith.constant 0 : index
    %c0_3 = arith.constant 0 : index
    %4 = vector.load %arg6[%c0_2, %c0_3] : memref<384x128xf32, #tpu.memory_space<vmem>>, vector<384x128xf32>
    %cst = arith.constant dense<0.000000e+00> : vector<8x128xf32>
    %5 = tpu.matmul %3, %4, %cst {dimension_numbers = #tpu.dot_dimension_numbers<[1], [0], [0], [1], [0, 0, 1, 1], [], []>} : vector<8x384xf32>, vector<384x128xf32>, vector<8x128xf32> -> vector<8x128xf32>
    %c0_4 = arith.constant 0 : index
    %c0_5 = arith.constant 0 : index
    %6 = vector.load %arg7[%c0_4, %c0_5] : memref<1x128xf32, #tpu.memory_space<vmem>>, vector<1x128xf32>
    %7 = vector.broadcast %6 : vector<1x128xf32> to vector<8x128xf32>
    %8 = arith.addf %5, %7 : vector<8x128xf32>
    %c0_6 = arith.constant 0 : index
    %c0_7 = arith.constant 0 : index
    %9 = vector.load %arg8[%c0_6, %c0_7] : memref<8x128xf32, #tpu.memory_space<vmem>>, vector<8x128xf32>
    tpu.vector_store %arg8[%c0_6, %c0_7], %8 {strides = array<i32>} : memref<8x128xf32, #tpu.memory_space<vmem>>, vector<8x128xf32>,
    return
  }
  func.func @transform_0(%arg0: i32) -> (i32, i32) {
    %c0_i32 = arith.constant 0 : i32
    %c0_i32_0 = arith.constant 0 : i32
    %c0_i32_1 = arith.constant 0 : i32
    return %c0_i32, %c0_i32_0 : i32, i32
  }
  func.func @transform_1(%arg0: i32) -> (i32, i32) {
    %c0_i32 = arith.constant 0 : i32
    %c0_i32_0 = arith.constant 0 : i32
    %c0_i32_1 = arith.constant 0 : i32
    return %c0_i32, %c0_i32_0 : i32, i32
  }
  func.func @transform_2(%arg0: i32) -> (i32, i32) {
    %c0_i32 = arith.constant 0 : i32
    %c0_i32_0 = arith.constant 0 : i32
    %c0_i32_1 = arith.constant 0 : i32
    return %c0_i32, %c0_i32_0 : i32, i32
  }
  func.func @transform_3(%arg0: i32) -> (i32, i32) {
    %c0_i32 = arith.constant 0 : i32
    %c0_i32_0 = arith.constant 0 : i32
    %c0_i32_1 = arith.constant 0 : i32
    return %c0_i32, %c0_i32_0 : i32, i32
  }
  func.func @transform_4(%arg0: i32) -> (i32, i32) {
    %c0_i32 = arith.constant 0 : i32
    %c0_i32_0 = arith.constant 0 : i32
    %c0_i32_1 = arith.constant 0 : i32
    return %c0_i32, %c0_i32_0 : i32, i32
  }
  func.func @transform_5(%arg0: i32) -> (i32, i32) {
    %c0_i32 = arith.constant 0 : i32
    %c0_i32_0 = arith.constant 0 : i32
    return %c0_i32, %arg0 : i32, i32
  }
  func.func @transform_6(%arg0: i32) -> (i32, i32) {
    %c0_i32 = arith.constant 0 : i32
    %c0_i32_0 = arith.constant 0 : i32
    return %c0_i32, %arg0 : i32, i32
  }
  func.func @transform_7(%arg0: i32) -> (i32, i32) {
    %c0_i32 = arith.constant 0 : i32
    %c0_i32_0 = arith.constant 0 : i32
    return %c0_i32, %arg0 : i32, i32
  }
}

</mosaic_0001>

<bundles_post_ra>
// kernel: tpu_custom_call.1
= control target key start
LH: loop header
LB: loop body
LE: loop exit
PB: predicated region body
PF: predicated region fallthrough
CT: control target
= control target key end

     0   :  { %12 = vsyncpa [#allocation4], 0  ;;  %s1002_s0 = inlined_call_operand.hbm [shape: f32[8,128], index: 0, kind: input, shape index: {}]   ;;  %s1003_s1 = inlined_call_operand.hbm [shape: f32[128,128], index: 1, kind: input, shape index: {}]   ;;  %s1004_s2 = inlined_call_operand.vmem [shape: f32[2,128], index: 2, kind: input, shape index: {}]   ;;  %s1005_s3 = inlined_call_operand.hbm [shape: f32[256,128], index: 3, kind: input, shape index: {}]   ;;  %s1006_s4 = inlined_call_operand.vmem [shape: f32[2,128], index: 4, kind: input, shape index: {}]   ;;  %s1007_s5 = inlined_call_operand.hbm [shape: f32[384,128], index: 5, kind: input, shape index: {}]   ;;  %s1008_s6 = inlined_call_operand.vmem [shape: f32[1,128], index: 6, kind: input, shape index: {}]   ;;  %s1009_s7 = inlined_call_operand.hbm [shape: f32[8,128], index: 7, kind: output, shape index: {}]  }
   0x1   :  { %13 = vsyncpa [#allocation7], 0 }
   0x2   :  { %14 = vsyncpa [#allocation10], 0 }
   0x3   :  { %15 = vsyncpa [#allocation5], 0  ;;  %s867_s24 = smov [#allocation6]  }
   0x4   :  { %s31_s25 = sshll.u32 %s867_s24, 4  ;;  %s32_s25 = int_to_ptr.vmem [resolvable:$true] %s31_s25 }
   0x5   :  { %s767_s26 = scalar_lea.vmem %s32_s25, 2048  ;;  %p772_p1 = scmp.lt.s32.totalorder %s32_s25, %s32_s25 }
   0x6   :  { %p768_p0 = scmp.ne.s32.totalorder %s32_s25, %s767_s26  ;;  %p773_p2 = scmp.lt.s32.totalorder %s767_s26, %s767_s26 }
   0x8   :  { %p774_p3 = por %p773_p2, %p772_p1 }
   0xa   :  { %p775_p4 = pnand %p774_p3, %p768_p0 }
   0xc   :  { %778 = shalt.err (!%p775_p4)
}
   0xd   :  { %s868_s27 = smov 128   ;;  %s869_s28 = smov 8  }
   0xe   :  { %37 = dma.hbm_to_vmem [thread:$0]  %s1003_s1, 2048, %s32_s25, [#allocation7], %s868_s27, %s868_s27, %s869_s28  }
   0xf   :  { %s870_s8 = smov [#allocation3]   ;;  %s871_s10 = smov [#allocation8]  }
  0x10   :  { %s22_s9 = sshll.u32 %s870_s8, 4  ;;  %s45_s11 = sshll.u32 %s871_s10, 4  ;;  %s23_s9 = int_to_ptr.vmem [resolvable:$true] %s22_s9  ;;  %s46_s11 = int_to_ptr.vmem [resolvable:$true] %s45_s11 }
  0x11   :  { %s787_s12 = scalar_lea.vmem %s23_s9, 128  ;;  %p792_p6 = scmp.lt.s32.totalorder %s23_s9, %s23_s9 }
  0x12   :  { %p788_p5 = scmp.ne.s32.totalorder %s23_s9, %s787_s12  ;;  %p793_p7 = scmp.lt.s32.totalorder %s787_s12, %s787_s12 }
  0x14   :  { %p794_p8 = por %p793_p7, %p792_p6 }
  0x16   :  { %p795_p9 = pnand %p794_p8, %p788_p5 }
  0x18   :  { %798 = shalt.err (!%p795_p9)
}
  0x19   :  { %25 = dma.hbm_to_vmem [thread:$0]  %s1002_s0, 128, %s23_s9, [#allocation4]  }
  0x1a   :  { %s807_s15 = scalar_lea.vmem %s46_s11, 4096  ;;  %p812_p11 = scmp.lt.s32.totalorder %s46_s11, %s46_s11 }
  0x1b   :  { %p808_p10 = scmp.ne.s32.totalorder %s46_s11, %s807_s15  ;;  %p813_p12 = scmp.lt.s32.totalorder %s807_s15, %s807_s15 }
  0x1d   :  { %p814_p13 = por %p813_p12, %p812_p11 }
  0x1f   :  { %p815_p0 = pnand %p814_p13, %p808_p10 }
  0x21   :  { %818 = shalt.err (!%p815_p0)
}
  0x22   :  { %51 = dma.hbm_to_vmem [thread:$0]  %s1005_s3, 4096, %s46_s11, [#allocation7], %s868_s27, %s868_s27, %s869_s28  }
  0x23   :  { %s872_s17 = smov [#allocation9]  }
  0x24   :  { %s59_s18 = sshll.u32 %s872_s17, 4  ;;  %s60_s18 = int_to_ptr.vmem [resolvable:$true] %s59_s18 }
  0x25   :  { %s827_s19 = scalar_lea.vmem %s60_s18, 6144  ;;  %p832_p2 = scmp.lt.s32.totalorder %s60_s18, %s60_s18 }
  0x26   :  { %p828_p1 = scmp.ne.s32.totalorder %s60_s18, %s827_s19  ;;  %p833_p3 = scmp.lt.s32.totalorder %s827_s19, %s827_s19 }
  0x28   :  { %p834_p4 = por %p833_p3, %p832_p2 }
  0x2a   :  { %p835_p5 = pnand %p834_p4, %p828_p1 }
  0x2c   :  { %838 = shalt.err (!%p835_p5)
}
  0x2d   :  { %65 = dma.hbm_to_vmem [thread:$0]  %s1007_s5, 6144, %s60_s18, [#allocation10], %s868_s27, %s868_s27, %s869_s28  }
  0x2e   :  { %859 = dma.done.wait [#allocation4], 128  }
  0x2f   :  { %860 = vsyncadd [#allocation4], 4294967168 }
  0x30   :  { %861 = dma.done.wait [#allocation7], 6144  }
  0x31   :  { %862 = vsyncadd [#allocation7], 4294961152 }
  0x32   :  { %863 = dma.done.wait [#allocation10], 6144  }
  0x33   :  { %864 = vsyncadd [#allocation10], 4294961152  ;;  %v873_v0 = vmov 0.0   ;;  %vm874_vm0 = vmmov 0   ;;  %v101_v1 = vld [vmem:[#allocation6 + $0x78] sm:$0xff]  ;;  %v100_v2 = vld [vmem:[#allocation6 + $0x70] sm:$0xff] }
  0x34   :  { %676 = vmatprep.subr.mxu0 %v873_v0  ;;  %708 = vmatprep.mubr.msk.f32.mxu0 %vm874_vm0, %v873_v0  ;;  %v99_v3 = vld [vmem:[#allocation6 + $0x68] sm:$0xff]  ;;  %v98_v4 = vld [vmem:[#allocation6 + $0x60] sm:$0xff]  ;;  %v97_v5 = vld [vmem:[#allocation6 + $0x58] sm:$0xff]  ;;  %s875_s23 = smov [#allocation11]  }
  0x35   :  { %677 = vmatpush3.msra.mxu0 %v101_v1  ;;  %v96_v6 = vld [vmem:[#allocation6 + $0x50] sm:$0xff]  ;;  %v95_v7 = vld [vmem:[#allocation6 + $0x48] sm:$0xff]  ;;  %v94_v8 = vld [vmem:[#allocation6 + $0x40] sm:$0xff]  ;;  %s560_s24 = sshll.u32 %s875_s23, 4  ;;  %s561_s24 = int_to_ptr.vmem [resolvable:$true] %s560_s24 }
  0x36   :  { %678 = vmatprep.subr.mxu0 %v873_v0  ;;  %v93_v9 = vld [vmem:[#allocation6 + $0x38] sm:$0xff]  ;;  %v92_v10 = vld [vmem:[#allocation6 + $0x30] sm:$0xff]  ;;  %v91_v11 = vld [vmem:[#allocation6 + $0x28] sm:$0xff]  ;;  %s839_s25 = scalar_lea.vmem %s561_s24, 128  ;;  %p844_p7 = scmp.lt.s32.totalorder %s561_s24, %s561_s24 }
  0x37   :  { %679 = vmatpush3.msra.mxu0 %v100_v2  ;;  %v90_v12 = vld [vmem:[#allocation6 + $0x20] sm:$0xff]  ;;  %v89_v13 = vld [vmem:[#allocation6 + $0x18] sm:$0xff]  ;;  %v88_v14 = vld [vmem:[#allocation6 + $0x10] sm:$0xff]  ;;  %p840_p6 = scmp.ne.s32.totalorder %s561_s24, %s839_s25  ;;  %p845_p8 = scmp.lt.s32.totalorder %s839_s25, %s839_s25 }
  0x38   :  { %680 = vmatprep.subr.mxu0 %v873_v0  ;;  %v87_v15 = vld [vmem:[#allocation6 + $0x8] sm:$0xff]  ;;  %v86_v16 = vld [vmem:[#allocation6] sm:$0xff]  ;;  %v954_v17 = vld [vmem:[#allocation3] sm:$0xff] }
  0x39   :  { %681 = vmatpush3.msra.mxu0 %v99_v3  ;;  %v243_v18 = vld [vmem:[#allocation8 + $0xf8] sm:$0xff]  ;;  %v242_v20 = vld [vmem:[#allocation8 + $0xf0] sm:$0xff]  ;;  %v241_v22 = vld [vmem:[#allocation8 + $0xe8] sm:$0xff]  ;;  %p846_p9 = por %p845_p8, %p844_p7 }
  0x3a   :  { %682 = vmatprep.subr.mxu0 %v873_v0  ;;  %589 = vmatprep.subr.mxu1 %v243_v18  ;;  %v227_v19 = vld [vmem:[#allocation8 + $0x78] sm:$0xff]  ;;  %v226_v21 = vld [vmem:[#allocation8 + $0x70] sm:$0xff]  ;;  %v225_v23 = vld [vmem:[#allocation8 + $0x68] sm:$0xff] }
  0x3b   :  { %683 = vmatpush3.msra.mxu0 %v98_v4  ;;  %590 = vmatpush3.msra.mxu1 %v227_v19  ;;  %v240_v24 = vld [vmem:[#allocation8 + $0xe0] sm:$0xff]  ;;  %v239_v26 = vld [vmem:[#allocation8 + $0xd8] sm:$0xff]  ;;  %v238_v28 = vld [vmem:[#allocation8 + $0xd0] sm:$0xff]  ;;  %p847_p10 = pnand %p846_p9, %p840_p6 }
  0x3c   :  { %684 = vmatprep.subr.mxu0 %v873_v0  ;;  %591 = vmatprep.subr.mxu1 %v242_v20  ;;  %v224_v25 = vld [vmem:[#allocation8 + $0x60] sm:$0xff]  ;;  %v223_v27 = vld [vmem:[#allocation8 + $0x58] sm:$0xff]  ;;  %v222_v29 = vld [vmem:[#allocation8 + $0x50] sm:$0xff] }
  0x3d   :  { %685 = vmatpush3.msra.mxu0 %v97_v5  ;;  %592 = vmatpush3.msra.mxu1 %v226_v21  ;;  %v237_v30 = vld [vmem:[#allocation8 + $0xc8] sm:$0xff]  ;;  %v236_v32 = vld [vmem:[#allocation8 + $0xc0] sm:$0xff]  ;;  %v235_v34 = vld [vmem:[#allocation8 + $0xb8] sm:$0xff] }
  0x3e   :  { %686 = vmatprep.subr.mxu0 %v873_v0  ;;  %593 = vmatprep.subr.mxu1 %v241_v22  ;;  %v221_v31 = vld [vmem:[#allocation8 + $0x48] sm:$0xff]  ;;  %v220_v33 = vld [vmem:[#allocation8 + $0x40] sm:$0xff]  ;;  %v219_v35 = vld [vmem:[#allocation8 + $0x38] sm:$0xff] }
  0x3f   :  { %687 = vmatpush3.msra.mxu0 %v96_v6  ;;  %594 = vmatpush3.msra.mxu1 %v225_v23  ;;  %v234_v36 = vld [vmem:[#allocation8 + $0xb0] sm:$0xff]  ;;  %v233_v38 = vld [vmem:[#allocation8 + $0xa8] sm:$0xff]  ;;  %v232_v40 = vld [vmem:[#allocation8 + $0xa0] sm:$0xff] }
  0x40   :  { %688 = vmatprep.subr.mxu0 %v873_v0  ;;  %595 = vmatprep.subr.mxu1 %v240_v24  ;;  %v218_v37 = vld [vmem:[#allocation8 + $0x30] sm:$0xff]  ;;  %v217_v39 = vld [vmem:[#allocation8 + $0x28] sm:$0xff]  ;;  %v216_v41 = vld [vmem:[#allocation8 + $0x20] sm:$0xff] }
  0x41   :  { %689 = vmatpush3.msra.mxu0 %v95_v7  ;;  %596 = vmatpush3.msra.mxu1 %v224_v25  ;;  %v231_v42 = vld [vmem:[#allocation8 + $0x98] sm:$0xff]  ;;  %v230_v44 = vld [vmem:[#allocation8 + $0x90] sm:$0xff]  ;;  %v229_v46 = vld [vmem:[#allocation8 + $0x88] sm:$0xff] }
  0x42   :  { %690 = vmatprep.subr.mxu0 %v873_v0  ;;  %597 = vmatprep.subr.mxu1 %v239_v26  ;;  %v215_v43 = vld [vmem:[#allocation8 + $0x18] sm:$0xff]  ;;  %v214_v45 = vld [vmem:[#allocation8 + $0x10] sm:$0xff]  ;;  %v213_v47 = vld [vmem:[#allocation8 + $0x8] sm:$0xff] }
  0x43   :  { %691 = vmatpush3.msra.mxu0 %v94_v8  ;;  %598 = vmatpush3.msra.mxu1 %v223_v27  ;;  %v228_v48 = vld [vmem:[#allocation8 + $0x80] sm:$0xff]  ;;  %v200_v8 = vlaneseq  ;;  %v389_v24 = vld [vmem:[#allocation9 + $0xf8] sm:$0xff]  ;;  %v388_v26 = vld [vmem:[#allocation9 + $0xf0] sm:$0xff] }
  0x44   :  { %692 = vmatprep.subr.mxu0 %v873_v0  ;;  %599 = vmatprep.subr.mxu1 %v238_v28  ;;  %v212_v49 = vld [vmem:[#allocation8] sm:$0xff]  ;;  %v373_v25 = vld [vmem:[#allocation9 + $0x78] sm:$0xff]  ;;  %v372_v27 = vld [vmem:[#allocation9 + $0x70] sm:$0xff] }
  0x45   :  { %693 = vmatpush3.msra.mxu0 %v93_v9  ;;  %600 = vmatpush3.msra.mxu1 %v222_v29  ;;  %v959_v9 = vshrl.u32 %v200_v8, 7  ;;  %v387_v28 = vld [vmem:[#allocation9 + $0xe8] sm:$0xff]  ;;  %v390_v8 = vld [vmem:[#allocation9 + $0x100] sm:$0xff] }
  0x46   :  { %694 = vmatprep.subr.mxu0 %v873_v0  ;;  %601 = vmatprep.subr.mxu1 %v237_v30  ;;  %v371_v29 = vld [vmem:[#allocation9 + $0x68] sm:$0xff]  ;;  %v386_v30 = vld [vmem:[#allocation9 + $0xe0] sm:$0xff] }
  0x47   :  { %695 = vmatpush3.msra.mxu0 %v92_v10  ;;  %602 = vmatpush3.msra.mxu1 %v221_v31  ;;  %v102_v10 = vld [vmem:[%s1004_s2] sm:$0x3]  ;;  %v207_v18 = vsub.s32 1, %v959_v9  ;;  %v370_v31 = vld [vmem:[#allocation9 + $0x60] sm:$0xff] }
  0x48   :  { %696 = vmatprep.subr.mxu0 %v873_v0  ;;  %603 = vmatprep.subr.mxu1 %v236_v32  ;;  %v385_v32 = vld [vmem:[#allocation9 + $0xd8] sm:$0xff] }
  0x49   :  { %697 = vmatpush3.msra.mxu0 %v91_v11  ;;  %604 = vmatpush3.msra.mxu1 %v220_v33  ;;  %v369_v33 = vld [vmem:[#allocation9 + $0x58] sm:$0xff] }
  0x4a   :  { %698 = vmatprep.subr.mxu0 %v873_v0  ;;  %605 = vmatprep.subr.mxu1 %v235_v34  ;;  %v405_v34 = vld [vmem:[#allocation9 + $0x178] sm:$0xff] }
  0x4b   :  { %699 = vmatpush3.msra.mxu0 %v90_v12  ;;  %606 = vmatpush3.msra.mxu1 %v219_v35  ;;  %v384_v35 = vld [vmem:[#allocation9 + $0xd0] sm:$0xff] }
  0x4c   :  { %700 = vmatprep.subr.mxu0 %v873_v0  ;;  %607 = vmatprep.subr.mxu1 %v234_v36  ;;  %v368_v36 = vld [vmem:[#allocation9 + $0x50] sm:$0xff] }
  0x4d   :  { %701 = vmatpush3.msra.mxu0 %v89_v13  ;;  %608 = vmatpush3.msra.mxu1 %v218_v37  ;;  %v202_v13 = vsub.s32 0, %v959_v9  ;;  %v404_v37 = vld [vmem:[#allocation9 + $0x170] sm:$0xff] }
  0x4e   :  { %702 = vmatprep.subr.mxu0 %v873_v0  ;;  %609 = vmatprep.subr.mxu1 %v233_v38  ;;  %v383_v38 = vld [vmem:[#allocation9 + $0xc8] sm:$0xff] }
  0x4f   :  { %703 = vmatpush3.msra.mxu0 %v88_v14  ;;  %610 = vmatpush3.msra.mxu1 %v217_v39  ;;  %v367_v39 = vld [vmem:[#allocation9 + $0x48] sm:$0xff] }
  0x50   :  { %704 = vmatprep.subr.mxu0 %v873_v0  ;;  %611 = vmatprep.subr.mxu1 %v232_v40  ;;  %v403_v40 = vld [vmem:[#allocation9 + $0x168] sm:$0xff] }
  0x51   :  { %705 = vmatpush3.msra.mxu0 %v87_v15  ;;  %612 = vmatpush3.msra.mxu1 %v216_v41  ;;  %v382_v41 = vld [vmem:[#allocation9 + $0xc0] sm:$0xff] }
  0x52   :  { %706 = vmatprep.subr.mxu0 %v873_v0  ;;  %613 = vmatprep.subr.mxu1 %v231_v42  ;;  %v366_v42 = vld [vmem:[#allocation9 + $0x40] sm:$0xff] }
  0x53   :  { %707 = vmatpush3.msra.mxu0 %v86_v16  ;;  %614 = vmatpush3.msra.mxu1 %v215_v43  ;;  %v402_v43 = vld [vmem:[#allocation9 + $0x160] sm:$0xff] }
  0x54   :  { %709 = vmatmul.mubr.f32.vlgmr.msra.gmra.mxu0 %v954_v17  ;;  %615 = vmatprep.subr.mxu1 %v230_v44  ;;  %v381_v44 = vld [vmem:[#allocation9 + $0xb8] sm:$0xff] }
  0x55   :  { %616 = vmatpush3.msra.mxu1 %v214_v45  ;;  %624 = vmatprep.subr.mxu0 %v389_v24  ;;  %v365_v45 = vld [vmem:[#allocation9 + $0x38] sm:$0xff] }
  0x56   :  { %617 = vmatprep.subr.mxu1 %v229_v46  ;;  %625 = vmatpush3.msra.mxu0 %v373_v25  ;;  %v401_v46 = vld [vmem:[#allocation9 + $0x158] sm:$0xff] }
  0x57   :  { %618 = vmatpush3.msra.mxu1 %v213_v47  ;;  %626 = vmatprep.subr.mxu0 %v388_v26  ;;  %v380_v47 = vld [vmem:[#allocation9 + $0xb0] sm:$0xff] }
  0x58   :  { %619 = vmatprep.subr.mxu1 %v228_v48  ;;  %627 = vmatpush3.msra.mxu0 %v372_v27  ;;  %v364_v48 = vld [vmem:[#allocation9 + $0x30] sm:$0xff] }
  0x59   :  { %620 = vmatpush3.msra.mxu1 %v212_v49  ;;  %628 = vmatprep.subr.mxu0 %v387_v28  ;;  %v400_v49 = vld [vmem:[#allocation9 + $0x150] sm:$0xff] }
  0x5a   :  { %711 = vmatprep.subr.mxu1 %v873_v0  ;;  %629 = vmatpush3.msra.mxu0 %v371_v29 }
  0x5b   :  { %630 = vmatprep.subr.mxu0 %v386_v30 }
  0x5c   :  { %631 = vmatpush3.msra.mxu0 %v370_v31 }
  0x5d   :  { %632 = vmatprep.subr.mxu0 %v385_v32 }
  0x5e   :  { %633 = vmatpush3.msra.mxu0 %v369_v33  ;;  %v244_v33 = vld [vmem:[%s1006_s4] sm:$0x3] }
  0x5f   :  { %634 = vmatprep.subr.mxu0 %v384_v35 }
  0x60   :  { %635 = vmatpush3.msra.mxu0 %v368_v36 }
  0x61   :  { %636 = vmatprep.subr.mxu0 %v383_v38 }
  0x62   :  { %637 = vmatpush3.msra.mxu0 %v367_v39 }
  0x63   :  { %638 = vmatprep.subr.mxu0 %v382_v41 }
  0x64   :  { %639 = vmatpush3.msra.mxu0 %v366_v42 }
  0x65   :  { %640 = vmatprep.subr.mxu0 %v381_v44 }
  0x66   :  { %641 = vmatpush3.msra.mxu0 %v365_v45 }
  0x67   :  { %642 = vmatprep.subr.mxu0 %v380_v47  ;;  %v571_v47 = vld [vmem:[%s1008_s6] ss:$0 sm:$0xff] }
  0x68   :  { %643 = vmatpush3.msra.mxu0 %v364_v48 }
 0x114   :  { %v170_v50 = vpop.f32.mrf.mxu0 }
 0x115   :  { %v174_v51 = vrot.slane %v170_v50, 4  ;;  %v181_v52 = vmul.f32 %v170_v50, %v170_v50 }
 0x116   :  { %v710_v53 = vpop.f32.mrf.mxu0 }
 0x117   :  { %v175_v54 = vadd.f32 %v174_v51, %v170_v50  ;;  %v182_v55 = vrot.slane %v181_v52, 4  ;;  %v363_v51 = vld [vmem:[#allocation9 + $0x28] sm:$0xff]  ;;  %v378_v53 = vld [vmem:[#allocation9 + $0xa0] sm:$0xff] }
 0x119   :  { %v176_v56 = vrot.slane %v175_v54, 2  ;;  %v183_v57 = vadd.f32 %v182_v55, %v181_v52  ;;  %v399_v52 = vld [vmem:[#allocation9 + $0x148] sm:$0xff]  ;;  %v398_v55 = vld [vmem:[#allocation9 + $0x140] sm:$0xff] }
 0x11b   :  { %v177_v58 = vadd.f32 %v176_v56, %v175_v54  ;;  %v184_v59 = vrot.slane %v183_v57, 2  ;;  %v362_v54 = vld [vmem:[#allocation9 + $0x20] sm:$0xff]  ;;  %v377_v56 = vld [vmem:[#allocation9 + $0x98] sm:$0xff] }
 0x11d   :  { %v178_v60 = vrot.slane %v177_v58, 1  ;;  %v185_v61 = vadd.f32 %v184_v59, %v183_v57  ;;  %v361_v57 = vld [vmem:[#allocation9 + $0x18] sm:$0xff]  ;;  %v376_v59 = vld [vmem:[#allocation9 + $0x90] sm:$0xff] }
 0x11f   :  { %v179_v62 = vadd.f32 %v178_v60, %v177_v58  ;;  %v186_v63 = vrot.slane %v185_v61, 1  ;;  %v397_v58 = vld [vmem:[#allocation9 + $0x138] sm:$0xff]  ;;  %v360_v60 = vld [vmem:[#allocation9 + $0x10] sm:$0xff] }
 0x121   :  { %v180_v1 = vmul.f32 0.125, %v179_v62  ;;  %v187_v2 = vadd.f32 %v186_v63, %v185_v61  ;;  %v396_v61 = vld [vmem:[#allocation9 + $0x130] sm:$0xff]  ;;  %v375_v62 = vld [vmem:[#allocation9 + $0x88] sm:$0xff] }
 0x122   :  { %v359_v63 = vld [vmem:[#allocation9 + $0x8] sm:$0xff] }
 0x123   :  { %v188_v3 = vmul.f32 0.125, %v187_v2  ;;  %v189_v4 = vmul.f32 %v180_v1, %v180_v1  ;;  %v374_v2 = vld [vmem:[#allocation9 + $0x80] sm:$0xff] }
 0x125   :  { %v190_v5 = vsub.f32 %v188_v3, %v189_v4  ;;  %v358_v3 = vld [vmem:[#allocation9] sm:$0xff] }
 0x126   :  { %v394_v4 = vld [vmem:[#allocation9 + $0x120] sm:$0xff] }
 0x127   :  { %v191_v6 = vmax.f32 %v190_v5, 0.0  ;;  %v393_v5 = vld [vmem:[#allocation9 + $0x118] sm:$0xff] }
 0x129   :  { %v192_v7 = vadd.f32 1e-05, %v191_v6  ;;  %v392_v6 = vld [vmem:[#allocation9 + $0x110] sm:$0xff] }
 0x12b   :  { %755 = vrsqrt.f32 %v192_v7  ;;  %v391_v7 = vld [vmem:[#allocation9 + $0x108] sm:$0xff] }
 0x138   :  { %v756_v11 = vpop.eup %755 }
 0x139   :  { %v194_v12 = vmul.f32 %v756_v11, %v102_v10 }
 0x13b   :  { %v195_v14 = vmul.f32 %v194_v12, %v180_v1  ;;  %v203_v16 = vrot.slane %v194_v12, %v202_v13  ;;  %v395_v1 = vld [vmem:[#allocation9 + $0x128] sm:$0xff] }
 0x13d   :  { %v197_v15 = vrot.slane %v195_v14, 7  ;;  %v204_v20 = vmul.f32 %v203_v16, %v170_v50  ;;  %v379_v50 = vld [vmem:[#allocation9 + $0xa8] sm:$0xff] }
 0x13e   :  { %644 = vmatprep.subr.mxu0 %v379_v50 }
 0x13f   :  { %v199_v19 = vsub.f32 %v102_v10, %v197_v15  ;;  %645 = vmatpush3.msra.mxu0 %v363_v51 }
 0x140   :  { %646 = vmatprep.subr.mxu0 %v378_v53 }
 0x141   :  { %v208_v21 = vrot.slane %v199_v19, %v207_v18  ;;  %647 = vmatpush3.msra.mxu0 %v362_v54 }
 0x142   :  { %648 = vmatprep.subr.mxu0 %v377_v56 }
 0x143   :  { %v209_v22 = vadd.f32 %v208_v21, %v204_v20  ;;  %649 = vmatpush3.msra.mxu0 %v361_v57 }
 0x144   :  { %650 = vmatprep.subr.mxu0 %v376_v59 }
 0x145   :  { %v210_v23 = vmax.f32 %v209_v22, 0.0  ;;  %651 = vmatpush3.msra.mxu0 %v360_v60 }
 0x146   :  { %652 = vmatprep.subr.mxu0 %v375_v62 }
 0x147   :  { %311 = vmatprep.mubr.f32.mxu1 %v210_v23  ;;  %477 = vmatprep.mubr.f32.mxu0 %v210_v23 }
 0x148   :  { %312 = vmatmul.mubr.f32.vlgmr.msra.gmra.mxu1 %v954_v17  ;;  %653 = vmatpush3.msra.mxu0 %v359_v63 }
 0x149   :  { %743 = vmatprep.mubr.msk.f32.mxu1 %vm874_vm0, %v873_v0  ;;  %712 = vmatpush3.msra.mxu1 %v405_v34 }
 0x14a   :  { %713 = vmatprep.subr.mxu1 %v873_v0  ;;  %654 = vmatprep.subr.mxu0 %v374_v2 }
 0x14b   :  { %714 = vmatpush3.msra.mxu1 %v404_v37  ;;  %655 = vmatpush3.msra.mxu0 %v358_v3 }
 0x14c   :  { %715 = vmatprep.subr.mxu1 %v873_v0  ;;  %478 = vmatmul.mubr.f32.vlgmr.msra.gmra.mxu0 %v954_v17 }
 0x14d   :  { %716 = vmatpush3.msra.mxu1 %v403_v40 }
 0x14e   :  { %717 = vmatprep.subr.mxu1 %v873_v0 }
 0x14f   :  { %718 = vmatpush3.msra.mxu1 %v402_v43 }
 0x150   :  { %719 = vmatprep.subr.mxu1 %v873_v0 }
 0x151   :  { %720 = vmatpush3.msra.mxu1 %v401_v46 }
 0x152   :  { %721 = vmatprep.subr.mxu1 %v873_v0 }
 0x153   :  { %722 = vmatpush3.msra.mxu1 %v400_v49 }
 0x154   :  { %723 = vmatprep.subr.mxu1 %v873_v0 }
 0x155   :  { %724 = vmatpush3.msra.mxu1 %v399_v52 }
 0x156   :  { %725 = vmatprep.subr.mxu1 %v873_v0 }
 0x157   :  { %726 = vmatpush3.msra.mxu1 %v398_v55 }
 0x158   :  { %727 = vmatprep.subr.mxu1 %v873_v0 }
 0x159   :  { %728 = vmatpush3.msra.mxu1 %v397_v58 }
 0x15a   :  { %729 = vmatprep.subr.mxu1 %v873_v0 }
 0x15b   :  { %730 = vmatpush3.msra.mxu1 %v396_v61 }
 0x15c   :  { %731 = vmatprep.subr.mxu1 %v873_v0 }
 0x15d   :  { %732 = vmatpush3.msra.mxu1 %v395_v1 }
 0x15e   :  { %733 = vmatprep.subr.mxu1 %v873_v0 }
 0x15f   :  { %734 = vmatpush3.msra.mxu1 %v394_v4 }
 0x160   :  { %735 = vmatprep.subr.mxu1 %v873_v0 }
 0x161   :  { %736 = vmatpush3.msra.mxu1 %v393_v5 }
 0x162   :  { %737 = vmatprep.subr.mxu1 %v873_v0 }
 0x163   :  { %738 = vmatpush3.msra.mxu1 %v392_v6 }
 0x164   :  { %739 = vmatprep.subr.mxu1 %v873_v0 }
 0x165   :  { %740 = vmatpush3.msra.mxu1 %v391_v7 }
 0x166   :  { %741 = vmatprep.subr.mxu1 %v873_v0 }
 0x167   :  { %742 = vmatpush3.msra.mxu1 %v390_v8 }
 0x208   :  { %v621_v10 = vpop.f32.mrf.mxu1 }
 0x20a   :  { %v622_v11 = vpop.f32.mrf.mxu1 }
 0x20b   :  { %v623_v12 = vadd.f32 %v622_v11, %v621_v10 }
 0x20c   :  { %v656_v44 = vpop.f32.mrf.mxu0 }
 0x20d   :  { %v317_v14 = vrot.slane %v623_v12, 4  ;;  %v324_v17 = vmul.f32 %v623_v12, %v623_v12 }
 0x20e   :  { %v657_v45 = vpop.f32.mrf.mxu0 }
 0x20f   :  { %v318_v15 = vadd.f32 %v623_v12, %v317_v14  ;;  %v325_v16 = vrot.slane %v324_v17, 4  ;;  %v658_v46 = vadd.f32 %v657_v45, %v656_v44 }
 0x211   :  { %v319_v19 = vrot.slane %v318_v15, 2  ;;  %v326_v20 = vadd.f32 %v325_v16, %v324_v17  ;;  %v480_v48 = vadd.f32 %v658_v46, %v571_v47 }
 0x213   :  { %v320_v21 = vadd.f32 %v319_v19, %v318_v15  ;;  %v327_v22 = vrot.slane %v326_v20, 2 }
 0x215   :  { %v321_v23 = vrot.slane %v320_v21, 1  ;;  %v328_v24 = vadd.f32 %v327_v22, %v326_v20 }
 0x217   :  { %v322_v25 = vadd.f32 %v321_v23, %v320_v21  ;;  %v329_v26 = vrot.slane %v328_v24, 1 }
 0x219   :  { %v323_v27 = vmul.f32 0.125, %v322_v25  ;;  %v330_v28 = vadd.f32 %v329_v26, %v328_v24 }
 0x21b   :  { %v331_v29 = vmul.f32 0.125, %v330_v28  ;;  %v332_v0 = vmul.f32 %v323_v27, %v323_v27 }
 0x21d   :  { %v333_v30 = vsub.f32 %v331_v29, %v332_v0 }
 0x21f   :  { %v334_v31 = vmax.f32 %v333_v30, 0.0 }
 0x221   :  { %v335_v32 = vadd.f32 1e-05, %v334_v31 }
 0x223   :  { %757 = vrsqrt.f32 %v335_v32 }
 0x230   :  { %v758_v34 = vpop.eup %757 }
 0x231   :  { %v337_v35 = vmul.f32 %v758_v34, %v244_v33 }
 0x233   :  { %v338_v36 = vmul.f32 %v337_v35, %v323_v27  ;;  %v346_v37 = vrot.slane %v337_v35, %v202_v13 }
 0x235   :  { %v340_v38 = vrot.slane %v338_v36, 7  ;;  %v347_v40 = vmul.f32 %v623_v12, %v346_v37 }
 0x237   :  { %v342_v39 = vsub.f32 %v244_v33, %v340_v38 }
 0x239   :  { %v351_v41 = vrot.slane %v342_v39, %v207_v18 }
 0x23b   :  { %v352_v42 = vadd.f32 %v351_v41, %v347_v40 }
 0x23d   :  { %v353_v43 = vmax.f32 %v352_v42, 0.0 }
 0x23f   :  { %744 = vmatmul.mubr.f32.vlgmr.msra.gmra.mxu1 %v353_v43 }
 0x2ff   :  { %v549_v13 = vpop.f32.mrf.mxu1 }
 0x300   :  { %v550_v49 = vadd.f32 %v549_v13, %v480_v48 }
 0x301   :  { %v745_v50 = vpop.f32.mrf.mxu1 }
 0x302   :  { %553 = vst [vmem:[#allocation11] sm:$0xff] %v550_v49 }
 0x303   :  { %850 = shalt.err (!%p847_p10)
}
 0x304   :  { %563 = dma.vmem_to_hbm [thread:$0]  %s561_s24, 128, %s1009_s7, [#allocation5]  }
 0x305   :  { %865 = dma.done.wait [#allocation5], 128  }
 0x306   :  { %866 = vsyncadd [#allocation5], 4294967168 }
 0x307   :  { %567 = vsyncpa [#allocation4], 1 }
 0x308   :  { %568 = vsyncpa [#allocation7], 1 }
 0x309   :  { %569 = vsyncpa [#allocation10], 1 }
 0x30a   :  { %570 = vsyncpa [#allocation5], 1 }

</bundles_post_ra>
